<compile_context>
chip_gen: v5e
topology: v5e:2x2
jax: 0.10.0
libtpu: 0.0.40
codegen_flags: <defaults>
</compile_context>

<pallas_src>
import functools

import jax
import jax.numpy as jnp
from jax.experimental import pallas as pl
from jax.experimental.pallas import tpu as pltpu


# ---------------------------------------------------------------------------
# Helpers
# ---------------------------------------------------------------------------
def _round_up(v: int, m: int) -> int:
    return ((v + m - 1) // m) * m


def _sublane_multiple(itemsize: int) -> int:
    # Native sublane packing: 8 rows for 32-bit, 16 for 16-bit, 32 for 8-bit.
    return 8 * max(1, 4 // max(1, itemsize))


def _vmem_budget() -> tuple[int, int]:
    """Returns (tile budget covering double-buffered in+out, vmem_limit_bytes)."""
    cap = None
    try:
        cap = getattr(pltpu.get_tpu_info(), "vmem_capacity_bytes", None)
    except Exception:
        cap = None
    if cap is not None and cap >= 100 * 1024 * 1024:   # v5e / v6e: 128 MiB VMEM
        return 16 * 1024 * 1024, 64 * 1024 * 1024
    # v7x (64 MiB physical) or unknown: stay conservative.
    return 8 * 1024 * 1024, 32 * 1024 * 1024


# ---------------------------------------------------------------------------
# Path 1 (default): zero-copy aliased identity — no HBM traffic in the kernel.
# ---------------------------------------------------------------------------
def _alias_identity_kernel(x_hbm, o_hbm, flag_smem):
    # Output aliases the input buffer: nothing to move. The trivial SMEM store
    # just keeps the lowered kernel body non-empty.
    del x_hbm, o_hbm
    flag_smem[0] = jnp.int32(0)


def model_forward_aliased(x: jax.Array) -> jax.Array:
    """Zero-copy identity: output aliases the input buffer (donation-friendly)."""
    return pl.pallas_call(
        _alias_identity_kernel,
        out_shape=jax.ShapeDtypeStruct(x.shape, x.dtype),
        in_specs=[pl.BlockSpec(memory_space=pl.ANY)],
        out_specs=pl.BlockSpec(memory_space=pl.ANY),
        scratch_shapes=[pltpu.SMEM((1,), jnp.int32)],
        input_output_aliases={0: 0},
        cost_estimate=pl.CostEstimate(flops=0, transcendentals=0,
                                      bytes_accessed=0),
    )(x)


# ---------------------------------------------------------------------------
# Path 2: materialized copy via split HBM->HBM DMAs (no VMEM round trip).
# ---------------------------------------------------------------------------
def _single_dma_copy_kernel(x_hbm, o_hbm, sem):
    cp = pltpu.make_async_copy(x_hbm, o_hbm, sem)
    cp.start()
    cp.wait()


def _split_dma_copy_kernel(x_hbm, o_hbm, sems, *, rows_per_prog, sub_rows,
                           n_inflight, aligned):
    p = pl.program_id(0)
    base = p * rows_per_prog

    def descr(k):
        start = base + k * sub_rows
        if aligned:
            start = pl.multiple_of(start, 8)
        return pltpu.make_async_copy(
            x_hbm.at[pl.ds(start, sub_rows)],
            o_hbm.at[pl.ds(start, sub_rows)],
            sems.at[k])

    for k in range(n_inflight):      # issue all DMAs first -> stay in flight
        descr(k).start()
    for k in range(n_inflight):
        descr(k).wait()


def _choose_split(rows: int, max_programs: int = 2, max_inflight: int = 2):
    for n_prog in (max_programs, 1):
        for n_inf in (max_inflight, 1):
            total = n_prog * n_inf
            if total <= rows and rows % total == 0:
                return n_prog, n_inf, rows // n_prog, rows // total
    return 1, 1, rows, rows


def model_forward_copy(x: jax.Array) -> jax.Array:
    """Materialized identity copy via HBM->HBM DMAs."""
    bytes_accessed = 2 * x.size * x.dtype.itemsize   # read + write
    cost = pl.CostEstimate(flops=0, transcendentals=0,
                           bytes_accessed=bytes_accessed)

    rows = x.shape[0] if x.ndim >= 1 else 0
    n_prog, n_inf, rows_per_prog, sub_rows = (
        _choose_split(rows) if rows >= 2 else (1, 1, rows, rows))

    if n_prog == 1 and n_inf == 1:
        # Fallback: one whole-array DMA (any rank, any leading-dim size).
        return pl.pallas_call(
            _single_dma_copy_kernel,
            out_shape=jax.ShapeDtypeStruct(x.shape, x.dtype),
            in_specs=[pl.BlockSpec(memory_space=pl.ANY)],
            out_specs=pl.BlockSpec(memory_space=pl.ANY),
            scratch_shapes=[pltpu.SemaphoreType.DMA(())],
            compiler_params=pltpu.CompilerParams(has_side_effects=True),
            cost_estimate=cost,
        )(x)

    kernel = functools.partial(
        _split_dma_copy_kernel,
        rows_per_prog=rows_per_prog, sub_rows=sub_rows, n_inflight=n_inf,
        aligned=(rows_per_prog % 8 == 0 and sub_rows % 8 == 0))
    return pl.pallas_call(
        kernel,
        out_shape=jax.ShapeDtypeStruct(x.shape, x.dtype),
        grid=(n_prog,),
        in_specs=[pl.BlockSpec(memory_space=pl.ANY)],
        out_specs=pl.BlockSpec(memory_space=pl.ANY),
        scratch_shapes=[pltpu.SemaphoreType.DMA((n_inf,))],
        compiler_params=pltpu.CompilerParams(
            dimension_semantics=("parallel",),   # shards across v7x's 2 TCs
            has_side_effects=True),
        cost_estimate=cost,
    )(x)


# ---------------------------------------------------------------------------
# Path 3: VMEM-staged tiled copy (the path real fused compute would use).
# ---------------------------------------------------------------------------
def _tiled_copy_kernel(x_ref, o_ref):
    o_ref[...] = x_ref[...]


def _pick_tile(rows: int, cols: int, itemsize: int, tile_budget_bytes: int):
    sublane = _sublane_multiple(itemsize)
    max_tile_bytes = tile_budget_bytes // 4   # double-buffered in + out

    # Column tiling (multiples of 128) only when one sublane-high row strip
    # already blows the budget; otherwise keep full lane-dense cols.
    tile_cols = cols
    if cols > 128 and cols * itemsize * sublane > max_tile_bytes:
        tile_cols = max(128,
                        (max_tile_bytes // (sublane * itemsize)) // 128 * 128)
        tile_cols = min(tile_cols, cols)

    if rows <= sublane:
        tile_rows = rows                       # full extent: always legal
    else:
        row_bytes = max(1, tile_cols * itemsize)
        tile_rows = max(sublane,
                        (max_tile_bytes // row_bytes) // sublane * sublane)
        # Cap so the row grid has >= 2 steps: a "parallel" grid can then shard
        # the copy across both v7x TensorCores (harmless on v5e/v6e).
        tile_rows = min(tile_rows, _round_up((rows + 1) // 2, sublane))
        if tile_rows >= rows:
            tile_rows = rows
    return tile_rows, tile_cols


def model_forward_tiled(x: jax.Array) -> jax.Array:
    orig_shape = x.shape
    if x.ndim == 0:
        x2 = x.reshape(1, 1)
    elif x.ndim == 1:
        x2 = x.reshape(1, x.shape[0])
    elif x.ndim == 2:
        x2 = x
    else:
        x2 = x.reshape(-1, x.shape[-1])        # keep last dim lane-dense
    rows, cols = x2.shape

    tile_budget, vmem_limit = _vmem_budget()
    tile_rows, tile_cols = _pick_tile(rows, cols, x.dtype.itemsize, tile_budget)
    grid = (pl.cdiv(rows, tile_rows), pl.cdiv(cols, tile_cols))
    bytes_accessed = 2 * x.size * x.dtype.itemsize

    y2 = pl.pallas_call(
        _tiled_copy_kernel,
        out_shape=jax.ShapeDtypeStruct((rows, cols), x.dtype),
        grid=grid,
        in_specs=[pl.BlockSpec((tile_rows, tile_cols), lambda i, j: (i, j))],
        out_specs=pl.BlockSpec((tile_rows, tile_cols), lambda i, j: (i, j)),
        compiler_params=pltpu.CompilerParams(
            dimension_semantics=("parallel", "parallel"),
            vmem_limit_bytes=vmem_limit),
        cost_estimate=pl.CostEstimate(flops=0, transcendentals=0,
                                      bytes_accessed=bytes_accessed),
    )(x2)
    return y2.reshape(orig_shape)


# ---------------------------------------------------------------------------
# JAX-side analogue of the abstract PyTorch `Model`.
# ---------------------------------------------------------------------------
class PallasModel:
    """No parameters (the reference __init__ creates none). The abstract
    forward is exposed as an identity over an input array."""

    def __init__(self):
        self.filepath = None  # interface parity only; no file I/O implemented

    def forward(self, x: jax.Array, donate_input: bool = True) -> jax.Array:
        if donate_input:
            return model_forward_aliased(x)   # zero-copy fast path
        return model_forward_copy(x)          # materialized copy

    __call__ = forward

    # save()/save_checkpoint()/load() intentionally not implemented:
    # torch.save/torch.load file I/O has no kernel equivalent.


if __name__ == "__main__":
    key = jax.random.PRNGKey(0)
    k1, k2 = jax.random.split(key)
    x = jax.random.normal(k1, (256, 128), dtype=jnp.float32)
    x3 = jax.random.normal(k2, (2, 64, 256), dtype=jnp.float32).astype(jnp.bfloat16)

    model = PallasModel()
    y_alias = model.forward(x)                       # aliased zero-copy identity
    y_copy = model.forward(x, donate_input=False)    # split HBM->HBM DMA copy
    y_tiled = model_forward_tiled(x)                 # VMEM-staged tiled copy
    y_copy3 = model_forward_copy(x3)                 # rank-3 copy path
    y_tiled3 = model_forward_tiled(x3)               # rank-3 / bf16 tiled path
    jax.block_until_ready((y_alias, y_copy, y_tiled, y_copy3, y_tiled3))

    for out, ref in ((y_alias, x), (y_copy, x), (y_tiled, x),
                     (y_copy3, x3), (y_tiled3, x3)):
        assert out.shape == ref.shape and out.dtype == ref.dtype
        assert bool(jnp.array_equal(out, ref))

    print("KERNEL_OK")
</pallas_src>

<mosaic_0001>
module attributes {stable_mosaic.version = 11 : i64} {
  func.func @_alias_identity_kernel(%arg0: memref<256x128xf32, #tpu.memory_space<any>>, %arg1: memref<256x128xf32, #tpu.memory_space<any>>, %arg2: memref<1xi32, #tpu.memory_space<smem>>) attributes {dimension_semantics = [], scalar_prefetch = 0 : i64, scratch_operands = 1 : i64, tpu.core_type = #tpu.core_type<tc>} {
    %c0_i32 = arith.constant 0 : i32
    %c0 = arith.constant 0 : index
    %0 = memref.load %arg2[%c0] : memref<1xi32, #tpu.memory_space<smem>>
    memref.store %c0_i32, %arg2[%c0] : memref<1xi32, #tpu.memory_space<smem>>
    return
  }
}

</mosaic_0001>

<bundles_post_ra>
// kernel: tpu_custom_call.1
= control target key start
LH: loop header
LB: loop body
LE: loop exit
PB: predicated region body
PF: predicated region fallthrough
CT: control target
= control target key end

     0   :  { %s18_s0 = inlined_call_operand.hbm [shape: f32[256,128], index: 0, kind: input, shape index: {}, may-alias: {0,1}]   ;;  %s19_s1 = inlined_call_operand.hbm [shape: f32[256,128], index: 1, kind: output, shape index: {}, may-alias: {0,1}]  }

</bundles_post_ra>
